<compile_context>
chip_gen: v6e
topology: v6e:2x2x1
jax: 0.10.0
libtpu: 0.0.40
codegen_flags: <defaults>
</compile_context>

<pallas_src>
import jax
import jax.numpy as jnp
from jax import lax
from jax.experimental import pallas as pl
from jax.experimental.pallas import tpu as pltpu

BN_EPS = 1e-5
LANE = 128


def _round_up(x, m):
    return (x + m - 1) // m * m


def _cdiv(a, b):
    return -(-a // b)


def _vmem_capacity_bytes():
    try:
        return int(pltpu.get_tpu_info().vmem_capacity_bytes)
    except Exception:
        return 64 << 20  # v7x physical VMEM — conservative fallback


def _pick_config(M, K, C_out, item, out_item, tile_m_req, resident_y):
    """Pick (tile_m, num_tiles, M_pad, resident, vmem_limit) from the VMEM budget."""
    budget = int(0.70 * _vmem_capacity_bytes())

    # Bytes that scale with the lane tile: double-buffered x and output blocks.
    per_col = 2 * (K * item + C_out * out_item)
    # Tile-independent buffers: weight block (x2), gamma/beta blocks, small f32 scratch.
    fixed = 2 * C_out * K * item + 2 * 2 * C_out * 4 + 4 * C_out * 4

    if tile_m_req is None:
        tile_m_req = 4096 if item >= 4 else 8192
    tile_m_req = max(LANE, _round_up(int(tile_m_req), LANE))

    # Leave roughly half the budget for the resident-y scratch / compiler headroom.
    pipe_budget = budget // 2
    by_budget = max(LANE, ((pipe_budget - fixed) // max(per_col, 1)) // LANE * LANE)
    tile_m = min(tile_m_req, by_budget, _round_up(M, LANE))

    # Rebalance tiles so the last one is not mostly padding.
    num_tiles = _cdiv(M, tile_m)
    tile_m = _round_up(_cdiv(M, num_tiles), LANE)
    M_pad = num_tiles * tile_m

    pipe_bytes = fixed + per_col * tile_m
    y_bytes = C_out * M_pad * 4                       # resident conv output, f32
    if resident_y is None:
        resident = pipe_bytes + y_bytes + (4 << 20) <= budget
    else:
        resident = bool(resident_y)

    need = pipe_bytes + (y_bytes if resident else 0) + (4 << 20)
    vmem_limit = int(min(budget, max(need, 16 << 20)))
    return tile_m, num_tiles, M_pad, resident, vmem_limit


def _make_fused_kernel(resident, tile_m, m_total):
    """Fused FactorizedReduce kernel body.  Grid = (2 phases, num_tiles).

    phase 0: ReLU + fused conv + BN sum / sum-of-squares (f32 scratch accumulators);
             if `resident`, the f32 conv output of every tile is parked in VMEM scratch.
    phase 1, tile 0: fold stats + gamma/beta into per-channel scale/shift (f32).
    phase 1: out = y * scale + shift, with y taken from VMEM scratch (resident) or
             recomputed from x (non-resident) — y never touches HBM either way.
    """

    def kernel(x_ref, w_ref, g_ref, b_ref, o_ref,
               y_scr, sum_scr, sq_scr, scale_scr, shift_scr):
        phase = pl.program_id(0)
        i = pl.program_id(1)

        @pl.when((phase == 0) & (i == 0))
        def _init():
            sum_scr[...] = jnp.zeros_like(sum_scr)
            sq_scr[...] = jnp.zeros_like(sq_scr)

        @pl.when(phase == 0)
        def _conv_and_stats():
            x = jnp.maximum(x_ref[...], 0)                                   # ReLU (VPU)
            # Both 1x1 stride-2 convs in one MXU matmul (block-diagonal fused weight).
            y = jnp.dot(w_ref[...], x, preferred_element_type=jnp.float32)   # (C, TM) f32
            if resident:
                off = pl.multiple_of(i * tile_m, LANE)
                y_scr[:, pl.ds(off, tile_m)] = y
            # One-pass BN statistics in f32; zero-padded columns contribute exactly 0.
            sum_scr[...] += jnp.sum(y, axis=1, keepdims=True)
            sq_scr[...] += jnp.sum(y * y, axis=1, keepdims=True)
            # TODO(synk): E[y^2]-E[y]^2 can cancel at very large M; a masked Welford
            # combine would be more robust at production scale.

        @pl.when((phase == 1) & (i == 0))
        def _fold_bn():
            inv_m = 1.0 / float(m_total)          # true element count (excludes padding)
            mean = sum_scr[...] * inv_m
            var = jnp.maximum(sq_scr[...] * inv_m - mean * mean, 0.0)
            scale = lax.rsqrt(var + BN_EPS) * g_ref[...]
            scale_scr[...] = scale
            shift_scr[...] = b_ref[...] - mean * scale

        @pl.when(phase == 1)
        def _normalize():
            if resident:
                off = pl.multiple_of(i * tile_m, LANE)
                y = y_scr[:, pl.ds(off, tile_m)]
            else:
                x = jnp.maximum(x_ref[...], 0)
                y = jnp.dot(w_ref[...], x, preferred_element_type=jnp.float32)
            o_ref[...] = (y * scale_scr[...] + shift_scr[...]).astype(o_ref.dtype)

    return kernel


def factorized_reduce(x, w1, w2, gamma, beta, *, tile_m=None, compute_dtype=None,
                      resident_y=None):
    """x: (N, C_in, H, W) NCHW; w1/w2: (C_out//2, C_in, 1, 1); gamma/beta: (C_out,).

    compute_dtype: dtype of the DMA'd activations/weights and MXU operands.  bf16 is
    recommended on v5e, v6e and v7x (the kernel is HBM-bound, so halving x bytes is a
    near-free win); stats, the resident conv output and all BN math stay in f32.
    resident_y: None = auto (keep the conv output resident in VMEM when it fits,
    else recompute it in the normalize phase); True/False forces the choice.
    """
    N, C_in, H, W = x.shape
    assert H % 2 == 0 and W % 2 == 0, "FactorizedReduce requires even H, W"
    Ho, Wo = H // 2, W // 2
    C_half = w1.shape[0]
    C_out = 2 * C_half
    K = 2 * C_in
    M = N * Ho * Wo

    out_dtype = x.dtype
    compute_dtype = jnp.dtype(compute_dtype if compute_dtype is not None else x.dtype)
    item = compute_dtype.itemsize
    out_item = jnp.dtype(out_dtype).itemsize

    tile_m, num_tiles, M_pad, resident, vmem_limit = _pick_config(
        M, K, C_out, item, out_item, tile_m, resident_y)

    # --- glue: stride-2 even/odd taps, channel-major (2*C_in, M), M on lanes ---------
    # One XLA repack pass over x (leading-axis swap only keeps W contiguous).
    # TODO(synk): gathering the stride-2 taps in-kernel (pl.ANY x + strided DMA or a
    # roll+select deinterleave) would cut input-side HBM traffic further; kept in XLA
    # here for robustness.
    x_r = x.reshape(N, C_in, Ho, 2, Wo, 2)
    x_cat = jnp.concatenate(
        [x_r[:, :, :, 0, :, 0],        # conv_1 taps: pixels (2h,   2w)
         x_r[:, :, :, 1, :, 1]],       # conv_2 taps: pixels (2h+1, 2w+1)
        axis=1)                        # (N, 2*C_in, Ho, Wo)
    x_cat = jnp.transpose(x_cat, (1, 0, 2, 3)).reshape(K, M)
    if M_pad != M:
        # Zero columns pass through ReLU/conv as zeros -> contribute 0 to the stats.
        x_cat = jnp.pad(x_cat, ((0, 0), (0, M_pad - M)))
    x_cat = x_cat.astype(compute_dtype)

    # Block-diagonal fused weight: y = W_fused @ relu([xe ; xo]) = [conv1 ; conv2].
    # (bf16 + tiny C could pad K/C_out up to 16-row sublane tiles, but the padded rows
    #  are real HBM bytes on a bandwidth-bound kernel, so it is not done by default.)
    w_fused = jnp.zeros((C_out, K), dtype=jnp.float32)
    w_fused = w_fused.at[:C_half, :C_in].set(w1.reshape(C_half, C_in).astype(jnp.float32))
    w_fused = w_fused.at[C_half:, C_in:].set(w2.reshape(C_half, C_in).astype(jnp.float32))
    w_fused = w_fused.astype(compute_dtype)

    gamma_col = gamma.astype(jnp.float32).reshape(C_out, 1)
    beta_col = beta.astype(jnp.float32).reshape(C_out, 1)

    last = num_tiles - 1
    if resident:
        # Phase 1 never touches x: park the block index on the last phase-0 block so no
        # extra x DMA is issued during the normalize phase.
        x_index = lambda p, i: (0, i * (1 - p) + last * p)
        x_reads = 1
    else:
        x_index = lambda p, i: (0, i)          # phase 1 re-reads x to recompute y
        x_reads = 2

    cost = pl.CostEstimate(
        flops=(2 if not resident else 1) * 2 * M_pad * K * C_out + 6 * M_pad * C_out,
        transcendentals=C_out,
        bytes_accessed=(x_reads * K * M_pad + C_out * K) * item
        + C_out * M_pad * out_item + 4 * C_out * 4,
    )

    out_cm = pl.pallas_call(
        _make_fused_kernel(resident, tile_m, M),
        out_shape=jax.ShapeDtypeStruct((C_out, M_pad), out_dtype),
        grid_spec=pltpu.PrefetchScalarGridSpec(
            num_scalar_prefetch=0,
            grid=(2, num_tiles),                        # (phase, M tile)
            in_specs=[
                # Sweep knob: pipeline_mode=pl.Buffered(3) here if tiles must stay small.
                pl.BlockSpec((K, tile_m), x_index),
                pl.BlockSpec((C_out, K), lambda p, i: (0, 0)),
                pl.BlockSpec((C_out, 1), lambda p, i: (0, 0)),
                pl.BlockSpec((C_out, 1), lambda p, i: (0, 0)),
            ],
            # Phase 0 never writes the output; parking its block index at 0 means the
            # first real writeback only happens after phase 1 has filled block 0.
            out_specs=pl.BlockSpec((C_out, tile_m), lambda p, i: (0, i * p)),
            scratch_shapes=[
                pltpu.VMEM((C_out, M_pad if resident else 1), jnp.float32),  # resident y
                pltpu.VMEM((C_out, 1), jnp.float32),    # per-channel sum
                pltpu.VMEM((C_out, 1), jnp.float32),    # per-channel sum of squares
                pltpu.VMEM((C_out, 1), jnp.float32),    # folded BN scale
                pltpu.VMEM((C_out, 1), jnp.float32),    # folded BN shift
            ],
        ),
        compiler_params=pltpu.CompilerParams(
            # Both axes carry VMEM-scratch state (stats / resident y) across iterations,
            # so they must stay sequential; see module docstring for the v7x note.
            dimension_semantics=("arbitrary", "arbitrary"),
            vmem_limit_bytes=vmem_limit,
        ),
        cost_estimate=cost,
    )(x_cat, w_fused, gamma_col, beta_col)

    # glue: (C_out, M) -> NCHW (drop M padding, leading-axis swap only).
    out_cm = out_cm[:, :M].reshape(C_out, N, Ho, Wo)
    return jnp.transpose(out_cm, (1, 0, 2, 3))


def reference(x, w1, w2, gamma, beta):
    """Pure-JAX reference matching the PyTorch module (BN training mode)."""
    xr = jnp.maximum(x, 0.0)
    dn = ('NCHW', 'OIHW', 'NCHW')
    y1 = lax.conv_general_dilated(xr, w1, (2, 2), 'VALID', dimension_numbers=dn)
    y2 = lax.conv_general_dilated(xr[:, :, 1:, 1:], w2, (2, 2), 'VALID',
                                  dimension_numbers=dn)
    y = jnp.concatenate([y1, y2], axis=1)
    mean = jnp.mean(y, axis=(0, 2, 3), keepdims=True)
    var = jnp.mean(jnp.square(y - mean), axis=(0, 2, 3), keepdims=True)
    yhat = (y - mean) / jnp.sqrt(var + BN_EPS)
    return yhat * gamma.reshape(1, -1, 1, 1) + beta.reshape(1, -1, 1, 1)


if __name__ == "__main__":
    # Module config: in_planes=4, out_planes=8, affine=True
    N, C_in, H, W = 2, 4, 16, 16
    C_out = 8
    C_half = C_out // 2

    key = jax.random.PRNGKey(0)
    kx, k1, k2, kx2 = jax.random.split(key, 4)

    x = jax.random.normal(kx, (N, C_in, H, W), dtype=jnp.float32)
    # Conv2d(in, out//2, 1, stride=2, bias=False) synthetic weights
    w1 = 0.1 * jax.random.normal(k1, (C_half, C_in, 1, 1), dtype=jnp.float32)
    w2 = 0.1 * jax.random.normal(k2, (C_half, C_in, 1, 1), dtype=jnp.float32)
    # BatchNorm2d(affine=True) init: weight=1, bias=0
    gamma = jnp.ones((C_out,), dtype=jnp.float32)
    beta = jnp.zeros((C_out,), dtype=jnp.float32)

    # 1) default config (VMEM-resident y, single tile)
    out = jax.block_until_ready(factorized_reduce(x, w1, w2, gamma, beta))
    ref = jax.block_until_ready(reference(x, w1, w2, gamma, beta))
    assert out.shape == (N, C_out, H // 2, W // 2), out.shape
    assert jnp.allclose(out, ref, rtol=1e-4, atol=1e-4), float(jnp.abs(out - ref).max())

    # 2) multi-tile grid + M-padding path (M=162 -> 2 tiles of 128 lanes), resident y.
    x2 = jax.random.normal(kx2, (N, C_in, 18, 18), dtype=jnp.float32)
    out2 = jax.block_until_ready(factorized_reduce(x2, w1, w2, gamma, beta, tile_m=128))
    ref2 = jax.block_until_ready(reference(x2, w1, w2, gamma, beta))
    assert jnp.allclose(out2, ref2, rtol=1e-4, atol=1e-4), float(jnp.abs(out2 - ref2).max())

    # 3) forced recompute path (y never materialized), multi-tile.
    out3 = jax.block_until_ready(
        factorized_reduce(x2, w1, w2, gamma, beta, tile_m=128, resident_y=False))
    assert jnp.allclose(out3, ref2, rtol=1e-4, atol=1e-4), float(jnp.abs(out3 - ref2).max())

    # 4) bf16 compute path (recommended on v5e/v6e/v7x); loose tolerance for bf16 x/w.
    out_bf16 = jax.block_until_ready(
        factorized_reduce(x, w1, w2, gamma, beta, compute_dtype=jnp.bfloat16))
    assert jnp.allclose(out_bf16, ref, rtol=1e-1, atol=1e-1), \
        float(jnp.abs(out_bf16 - ref).max())

    print("KERNEL_OK")
</pallas_src>

<mosaic_0001>
module attributes {stable_mosaic.version = 11 : i64} {
  func.func @kernel(%arg0: i32, %arg1: i32, %arg2: memref<8x128xf32, #tpu.memory_space<vmem>>, %arg3: memref<8x8xf32, #tpu.memory_space<vmem>>, %arg4: memref<8x1xf32, #tpu.memory_space<vmem>>, %arg5: memref<8x1xf32, #tpu.memory_space<vmem>>, %arg6: memref<8x128xf32, #tpu.memory_space<vmem>>, %arg7: memref<8x128xf32, #tpu.memory_space<vmem>>, %arg8: memref<8x1xf32, #tpu.memory_space<vmem>>, %arg9: memref<8x1xf32, #tpu.memory_space<vmem>>, %arg10: memref<8x1xf32, #tpu.memory_space<vmem>>, %arg11: memref<8x1xf32, #tpu.memory_space<vmem>>) attributes {dimension_semantics = [#tpu.dimension_semantics<arbitrary>, #tpu.dimension_semantics<arbitrary>], iteration_bounds = array<i64: 2, 1>, scalar_prefetch = 0 : i64, scratch_operands = 5 : i64, tpu.core_type = #tpu.core_type<tc>, window_params = [{transform_indices = @transform_0, window_bounds = array<i64: 8, 128>}, {pipeline_mode = #tpu.pipeline_mode<synchronous>, transform_indices = @transform_1, window_bounds = array<i64: 8, 8>}, {pipeline_mode = #tpu.pipeline_mode<synchronous>, transform_indices = @transform_2, window_bounds = array<i64: 8, 1>}, {pipeline_mode = #tpu.pipeline_mode<synchronous>, transform_indices = @transform_3, window_bounds = array<i64: 8, 1>}, {transform_indices = @transform_4, window_bounds = array<i64: 8, 128>}]} {
    %c0_i32 = arith.constant 0 : i32
    %0 = arith.cmpi eq, %arg0, %c0_i32 : i32
    %c0_i32_0 = arith.constant 0 : i32
    %1 = arith.cmpi eq, %arg1, %c0_i32_0 : i32
    %2 = arith.andi %0, %1 : i1
    %3 = arith.extui %2 : i1 to i32
    %c0_i32_1 = arith.constant 0 : i32
    %4 = arith.cmpi ne, %3, %c0_i32_1 : i32
    scf.if %4 {
      %cst = arith.constant 0.000000e+00 : f32
      %16 = vector.broadcast %cst : f32 to vector<8x1xf32>
      %c0 = arith.constant 0 : index
      %c0_8 = arith.constant 0 : index
      %17 = vector.load %arg8[%c0, %c0_8] : memref<8x1xf32, #tpu.memory_space<vmem>>, vector<8x1xf32>
      tpu.vector_store %arg8[%c0, %c0_8], %16 {strides = array<i32>} : memref<8x1xf32, #tpu.memory_space<vmem>>, vector<8x1xf32>,
      %cst_9 = arith.constant 0.000000e+00 : f32
      %18 = vector.broadcast %cst_9 : f32 to vector<8x1xf32>
      %c0_10 = arith.constant 0 : index
      %c0_11 = arith.constant 0 : index
      %19 = vector.load %arg9[%c0_10, %c0_11] : memref<8x1xf32, #tpu.memory_space<vmem>>, vector<8x1xf32>
      tpu.vector_store %arg9[%c0_10, %c0_11], %18 {strides = array<i32>} : memref<8x1xf32, #tpu.memory_space<vmem>>, vector<8x1xf32>,
    } else {
    }
    %c0_i32_2 = arith.constant 0 : i32
    %5 = arith.cmpi eq, %arg0, %c0_i32_2 : i32
    %6 = arith.extui %5 : i1 to i32
    %c0_i32_3 = arith.constant 0 : i32
    %7 = arith.cmpi ne, %6, %c0_i32_3 : i32
    scf.if %7 {
      %c0 = arith.constant 0 : index
      %c0_8 = arith.constant 0 : index
      %16 = vector.load %arg2[%c0, %c0_8] : memref<8x128xf32, #tpu.memory_space<vmem>>, vector<8x128xf32>
      %cst = arith.constant 0.000000e+00 : f32
      %17 = vector.broadcast %cst : f32 to vector<8x128xf32>
      %18 = arith.maximumf %16, %17 : vector<8x128xf32>
      %c0_9 = arith.constant 0 : index
      %c0_10 = arith.constant 0 : index
      %19 = vector.load %arg3[%c0_9, %c0_10] : memref<8x8xf32, #tpu.memory_space<vmem>>, vector<8x8xf32>
      %cst_11 = arith.constant dense<0.000000e+00> : vector<8x128xf32>
      %20 = tpu.matmul %19, %18, %cst_11 {dimension_numbers = #tpu.dot_dimension_numbers<[1], [0], [0], [1], [0, 0, 1, 1], [], []>} : vector<8x8xf32>, vector<8x128xf32>, vector<8x128xf32> -> vector<8x128xf32>
      %c128_i32 = arith.constant 128 : i32
      %21 = arith.muli %arg1, %c128_i32 : i32
      %22 = tpu.assume_multiple %21, 128 : i32
      %c0_12 = arith.constant 0 : index
      %23 = arith.index_cast %22 : i32 to index
      %24 = vector.load %arg7[%c0_12, %23] : memref<8x128xf32, #tpu.memory_space<vmem>>, vector<8x128xf32>
      tpu.vector_store %arg7[%c0_12, %23], %20 {strides = array<i32>} : memref<8x128xf32, #tpu.memory_space<vmem>>, vector<8x128xf32>,
      %c0_13 = arith.constant 0 : index
      %c0_14 = arith.constant 0 : index
      %25 = vector.load %arg8[%c0_13, %c0_14] : memref<8x1xf32, #tpu.memory_space<vmem>>, vector<8x1xf32>
      %cst_15 = arith.constant dense<0.000000e+00> : vector<8xf32>
      %26 = vector.multi_reduction <add>, %20, %cst_15 [1] : vector<8x128xf32> to vector<8xf32>
      %27 = vector.shape_cast %26 : vector<8xf32> to vector<8x1xf32>
      %28 = arith.addf %25, %27 : vector<8x1xf32>
      %c0_16 = arith.constant 0 : index
      %c0_17 = arith.constant 0 : index
      %29 = vector.load %arg8[%c0_16, %c0_17] : memref<8x1xf32, #tpu.memory_space<vmem>>, vector<8x1xf32>
      tpu.vector_store %arg8[%c0_16, %c0_17], %28 {strides = array<i32>} : memref<8x1xf32, #tpu.memory_space<vmem>>, vector<8x1xf32>,
      %c0_18 = arith.constant 0 : index
      %c0_19 = arith.constant 0 : index
      %30 = vector.load %arg9[%c0_18, %c0_19] : memref<8x1xf32, #tpu.memory_space<vmem>>, vector<8x1xf32>
      %31 = arith.mulf %20, %20 : vector<8x128xf32>
      %cst_20 = arith.constant dense<0.000000e+00> : vector<8xf32>
      %32 = vector.multi_reduction <add>, %31, %cst_20 [1] : vector<8x128xf32> to vector<8xf32>
      %33 = vector.shape_cast %32 : vector<8xf32> to vector<8x1xf32>
      %34 = arith.addf %30, %33 : vector<8x1xf32>
      %c0_21 = arith.constant 0 : index
      %c0_22 = arith.constant 0 : index
      %35 = vector.load %arg9[%c0_21, %c0_22] : memref<8x1xf32, #tpu.memory_space<vmem>>, vector<8x1xf32>
      tpu.vector_store %arg9[%c0_21, %c0_22], %34 {strides = array<i32>} : memref<8x1xf32, #tpu.memory_space<vmem>>, vector<8x1xf32>,
    } else {
    }
    %c1_i32 = arith.constant 1 : i32
    %8 = arith.cmpi eq, %arg0, %c1_i32 : i32
    %c0_i32_4 = arith.constant 0 : i32
    %9 = arith.cmpi eq, %arg1, %c0_i32_4 : i32
    %10 = arith.andi %8, %9 : i1
    %11 = arith.extui %10 : i1 to i32
    %c0_i32_5 = arith.constant 0 : i32
    %12 = arith.cmpi ne, %11, %c0_i32_5 : i32
    scf.if %12 {
      %c0 = arith.constant 0 : index
      %c0_8 = arith.constant 0 : index
      %16 = vector.load %arg8[%c0, %c0_8] : memref<8x1xf32, #tpu.memory_space<vmem>>, vector<8x1xf32>
      %cst = arith.constant 7.812500e-03 : f32
      %17 = vector.broadcast %cst : f32 to vector<8x1xf32>
      %18 = arith.mulf %16, %17 : vector<8x1xf32>
      %c0_9 = arith.constant 0 : index
      %c0_10 = arith.constant 0 : index
      %19 = vector.load %arg9[%c0_9, %c0_10] : memref<8x1xf32, #tpu.memory_space<vmem>>, vector<8x1xf32>
      %cst_11 = arith.constant 7.812500e-03 : f32
      %20 = vector.broadcast %cst_11 : f32 to vector<8x1xf32>
      %21 = arith.mulf %19, %20 : vector<8x1xf32>
      %22 = arith.mulf %18, %18 : vector<8x1xf32>
      %23 = arith.subf %21, %22 : vector<8x1xf32>
      %cst_12 = arith.constant 0.000000e+00 : f32
      %24 = vector.broadcast %cst_12 : f32 to vector<8x1xf32>
      %25 = arith.maximumf %23, %24 : vector<8x1xf32>
      %cst_13 = arith.constant 9.99999974E-6 : f32
      %26 = vector.broadcast %cst_13 : f32 to vector<8x1xf32>
      %27 = arith.addf %25, %26 : vector<8x1xf32>
      %28 = math.rsqrt %27 : vector<8x1xf32>
      %c0_14 = arith.constant 0 : index
      %c0_15 = arith.constant 0 : index
      %29 = vector.load %arg4[%c0_14, %c0_15] : memref<8x1xf32, #tpu.memory_space<vmem>>, vector<8x1xf32>
      %30 = arith.mulf %28, %29 : vector<8x1xf32>
      %c0_16 = arith.constant 0 : index
      %c0_17 = arith.constant 0 : index
      %31 = vector.load %arg10[%c0_16, %c0_17] : memref<8x1xf32, #tpu.memory_space<vmem>>, vector<8x1xf32>
      tpu.vector_store %arg10[%c0_16, %c0_17], %30 {strides = array<i32>} : memref<8x1xf32, #tpu.memory_space<vmem>>, vector<8x1xf32>,
      %c0_18 = arith.constant 0 : index
      %c0_19 = arith.constant 0 : index
      %32 = vector.load %arg5[%c0_18, %c0_19] : memref<8x1xf32, #tpu.memory_space<vmem>>, vector<8x1xf32>
      %33 = arith.mulf %18, %30 : vector<8x1xf32>
      %34 = arith.subf %32, %33 : vector<8x1xf32>
      %c0_20 = arith.constant 0 : index
      %c0_21 = arith.constant 0 : index
      %35 = vector.load %arg11[%c0_20, %c0_21] : memref<8x1xf32, #tpu.memory_space<vmem>>, vector<8x1xf32>
      tpu.vector_store %arg11[%c0_20, %c0_21], %34 {strides = array<i32>} : memref<8x1xf32, #tpu.memory_space<vmem>>, vector<8x1xf32>,
    } else {
    }
    %c1_i32_6 = arith.constant 1 : i32
    %13 = arith.cmpi eq, %arg0, %c1_i32_6 : i32
    %14 = arith.extui %13 : i1 to i32
    %c0_i32_7 = arith.constant 0 : i32
    %15 = arith.cmpi ne, %14, %c0_i32_7 : i32
    scf.if %15 {
      %c128_i32 = arith.constant 128 : i32
      %16 = arith.muli %arg1, %c128_i32 : i32
      %17 = tpu.assume_multiple %16, 128 : i32
      %c0 = arith.constant 0 : index
      %18 = arith.index_cast %17 : i32 to index
      %19 = vector.load %arg7[%c0, %18] : memref<8x128xf32, #tpu.memory_space<vmem>>, vector<8x128xf32>
      %c0_8 = arith.constant 0 : index
      %c0_9 = arith.constant 0 : index
      %20 = vector.load %arg10[%c0_8, %c0_9] : memref<8x1xf32, #tpu.memory_space<vmem>>, vector<8x1xf32>
      %21 = vector.broadcast %20 : vector<8x1xf32> to vector<8x128xf32>
      %22 = arith.mulf %19, %21 : vector<8x128xf32>
      %c0_10 = arith.constant 0 : index
      %c0_11 = arith.constant 0 : index
      %23 = vector.load %arg11[%c0_10, %c0_11] : memref<8x1xf32, #tpu.memory_space<vmem>>, vector<8x1xf32>
      %24 = vector.broadcast %23 : vector<8x1xf32> to vector<8x128xf32>
      %25 = arith.addf %22, %24 : vector<8x128xf32>
      %c0_12 = arith.constant 0 : index
      %c0_13 = arith.constant 0 : index
      %26 = vector.load %arg6[%c0_12, %c0_13] : memref<8x128xf32, #tpu.memory_space<vmem>>, vector<8x128xf32>
      tpu.vector_store %arg6[%c0_12, %c0_13], %25 {strides = array<i32>} : memref<8x128xf32, #tpu.memory_space<vmem>>, vector<8x128xf32>,
    } else {
    }
    return
  }
  func.func @transform_0(%arg0: i32, %arg1: i32) -> (i32, i32) {
    %c1_i32 = arith.constant 1 : i32
    %0 = arith.subi %c1_i32, %arg0 : i32
    %1 = arith.muli %arg1, %0 : i32
    %c0_i32 = arith.constant 0 : i32
    %2 = arith.muli %c0_i32, %arg0 : i32
    %3 = arith.addi %1, %2 : i32
    %c0_i32_0 = arith.constant 0 : i32
    %c0_i32_1 = arith.constant 0 : i32
    return %c0_i32_0, %3 : i32, i32
  }
  func.func @transform_1(%arg0: i32, %arg1: i32) -> (i32, i32) {
    %c0_i32 = arith.constant 0 : i32
    %c0_i32_0 = arith.constant 0 : i32
    %c0_i32_1 = arith.constant 0 : i32
    return %c0_i32, %c0_i32_0 : i32, i32
  }
  func.func @transform_2(%arg0: i32, %arg1: i32) -> (i32, i32) {
    %c0_i32 = arith.constant 0 : i32
    %c0_i32_0 = arith.constant 0 : i32
    %c0_i32_1 = arith.constant 0 : i32
    return %c0_i32, %c0_i32_0 : i32, i32
  }
  func.func @transform_3(%arg0: i32, %arg1: i32) -> (i32, i32) {
    %c0_i32 = arith.constant 0 : i32
    %c0_i32_0 = arith.constant 0 : i32
    %c0_i32_1 = arith.constant 0 : i32
    return %c0_i32, %c0_i32_0 : i32, i32
  }
  func.func @transform_4(%arg0: i32, %arg1: i32) -> (i32, i32) {
    %0 = arith.muli %arg1, %arg0 : i32
    %c0_i32 = arith.constant 0 : i32
    %c0_i32_0 = arith.constant 0 : i32
    return %c0_i32, %0 : i32, i32
  }
}

</mosaic_0001>

<bundles_post_ra>
// kernel: tpu_custom_call.1
= control target key start
LH: loop header
LB: loop body
LE: loop exit
PB: predicated region body
PF: predicated region fallthrough
CT: control target
= control target key end

     0   :  { %9 = vsyncpa [#allocation8], 0  ;;  %s669_s0 = inlined_call_operand.vmem [shape: f32[8,128], index: 0, kind: input, shape index: {}]   ;;  %s670_s1 = inlined_call_operand.vmem [shape: f32[8,8], index: 1, kind: input, shape index: {}]   ;;  %s671_s2 = inlined_call_operand.vmem [shape: f32[8,1], index: 2, kind: input, shape index: {}]   ;;  %s672_s3 = inlined_call_operand.vmem [shape: f32[8,1], index: 3, kind: input, shape index: {}]   ;;  %s673_s4 = inlined_call_operand.hbm [shape: f32[8,128], index: 4, kind: output, shape index: {}]  }
   0x1   :  { %11 = vsyncpa [#allocation8 + $0x1], 0  ;;  %s606_s15 = smov 0   ;;  %s608_s16 = smov 0  }
   0x2   :  { %s610_s17 = smov 0  }
   0x3 LB: > { %s457_s18 = sadd.s32 4294967295, %s574_s17   ;;  %s458_s19 = sadd.s32 4294967294, %s574_s17   ;;  %s574_s17 = sphi %s610_s17, %s17_s17   ;;  %s570_s16 = sphi %s608_s16, %s676_s16   ;;  %s566_s15 = sphi %s606_s15, %s675_s15  }
   0x4   : > { %s29_s20 = sadd.s32 1, %s570_s16  ;;  %p462_p0 = scmp.ge.s32.totalorder %s574_s17, 1 }
   0x5   : > { %p31_p1 = scmp.ge.s32.totalorder %s29_s20, 2  ;;  %p186_p2 = scmp.lt.s32.totalorder %s574_s17, 3 }
   0x7   : > { %s678_s20 = smov (%p31_p1, %s29_s20), 0  ;;  %p187_p3 = pnand %p462_p0, %p186_p2 }
   0x8   : > { %p222_p4 = scmp.eq.s32.totalorder (!%p187_p3), %s566_s15, 0 }
   0x9   : > { %190 = sbr.rel (%p187_p3) target bundleno = 557 (0x22d), region = 36 }
   0xe   : > { %227 = sbr.rel (!%p222_p4) target bundleno = 19 (0x13), region = 40  ;;  %vm228_vm0 = vcmask (%p222_p4), 7168   ;;  %v576_v0 = vmov (%p222_p4), 0.0  }
   0xf   : > { %229 = vst.msk [vmem:[#allocation3] sm:$0xff] (%p222_p4), %vm228_vm0, %v576_v0  ;;  %230 = vst.msk [vmem:[#allocation4] sm:$0xff] (%p222_p4), %vm228_vm0, %v576_v0 }
  0x13 PF: > { %p464_p5 = scmp.ne.s32.totalorder %s566_s15, 0 }
  0x15   : > { %233 = sbr.rel (%p464_p5) target bundleno = 368 (0x170), region = 44 }
  0x1a   : > { %v234_v1 = vld [vmem:[%s669_s0] sm:$0xff]  ;;  %v577_v2 = vmov 0.0   ;;  %vm578_vm1 = vmmov 0   ;;  %vm237_vm2 = vcmask 64512   ;;  %v316_v8 = vld [vmem:[#allocation3] sm:$0xff]  ;;  %vm320_vm3 = vcmask 7168  }
  0x1b   : > { %476 = vmatprep.subr.mxu0 %v577_v2  ;;  %v235_v3 = vmax.f32 %v234_v1, 0.0  ;;  %478 = vmatprep.mubr.msk.f32.mxu0 %vm578_vm1, %v577_v2  ;;  %v236_v4 = vld [vmem:[%s670_s1] sm:$0xff]  ;;  %v322_v11 = vld [vmem:[#allocation4] sm:$0xff] }
  0x1d   : > { %477 = vmatpush3.msra.mxu0 %v235_v3 }
  0x1e   : > { %479 = vmatmul.mubr.msk.f32.vlgmr.msra.gmra.mxu0 %vm237_vm2, %v236_v4 }
  0xde   : > { %v307_v5 = vpop.f32.mrf.mxu0 }
  0xdf   : > { %315 = vst [vmem:[#allocation2] sm:$0xff] %v307_v5  ;;  %317 = vadd.xlane.f32.xlu0 %v307_v5  ;;  %v323_v7 = vmul.f32 %v307_v5, %v307_v5 }
  0xe0   : > { %v480_v6 = vpop.f32.mrf.mxu0 }
  0xe3   : > { %324 = vadd.xlane.f32.xlu0 %v323_v7 }
 0x168   : > { %v318_v9 = vpop.xlane.xlu0 %317 }
 0x169   : > { %v319_v10 = vadd.f32 %v318_v9, %v316_v8 }
 0x16b   : > { %321 = vst.msk [vmem:[#allocation3] sm:$0xff] %vm320_vm3, %v319_v10 }
 0x16c   : > { %v325_v12 = vpop.xlane.xlu0 %324 }
 0x16d   : > { %v326_v13 = vadd.f32 %v325_v12, %v322_v11 }
 0x16f   : > { %327 = vst.msk [vmem:[#allocation4] sm:$0xff] %vm320_vm3, %v326_v13 }
 0x170 PF: > { %p328_p6 = scmp.eq.s32.totalorder %s566_s15, 1 }
 0x171   : > { %v342_v22 = vld [vmem:[%s671_s2] sm:$0xff] (%p328_p6)  ;;  %vm344_vm4 = vcmask (%p328_p6), 7168  }
 0x172   : > { %332 = sbr.rel (!%p328_p6) target bundleno = 404 (0x194), region = 48  ;;  %v333_v14 = vld [vmem:[#allocation3] sm:$0xff] (%p328_p6)  ;;  %v346_v25 = vld [vmem:[%s672_s3] sm:$0xff] (%p328_p6) }
 0x173   : > { %v334_v16 = vmul.f32 (%p328_p6), 0.0078125, %v333_v14 }
 0x175   : > { %v337_v18 = vmul.f32 (%p328_p6), %v334_v16, %v334_v16 }
 0x176   : > { %v335_v15 = vld [vmem:[#allocation4] sm:$0xff] (%p328_p6) }
 0x177   : > { %v336_v17 = vmul.f32 0.0078125, %v335_v15 }
 0x179   : > { %v338_v19 = vsub.f32 %v336_v17, %v337_v18 }
 0x17b   : > { %v339_v20 = vmax.f32 %v338_v19, 0.0 }
 0x17d   : > { %v340_v21 = vadd.f32 1e-05, %v339_v20 }
 0x17f   : > { %521 = vrsqrt.f32 %v340_v21 }
 0x18c   : > { %v522_v23 = vpop.eup %521 }
 0x18d   : > { %v343_v24 = vmul.f32 %v522_v23, %v342_v22 }
 0x18f   : > { %345 = vst.msk [vmem:[#allocation5] sm:$0xff] %vm344_vm4, %v343_v24  ;;  %v347_v26 = vmul.f32 %v343_v24, %v334_v16 }
 0x191   : > { %v348_v27 = vsub.f32 %v346_v25, %v347_v26 }
 0x193   : > { %349 = vst.msk [vmem:[#allocation6] sm:$0xff] %vm344_vm4, %v348_v27 }
 0x194 PF: > { %p467_p7 = scmp.ne.s32.totalorder %s566_s15, 1 }
 0x196   : > { %352 = sbr.rel (%p467_p7) target bundleno = 544 (0x220), region = 52 }
 0x19b   : > { %v358_v28 = vld [vmem:[#allocation5] sm:$0xff]  ;;  %v579_v29 = vmov 0   ;;  %v365_v30 = vld [vmem:[#allocation6] sm:$0xff] }
 0x19c   : > { %523 = vset.pattern.permute.xlu0 %v579_v29  ;;  %v357_v32 = vld [vmem:[#allocation2] sm:$0xff] }
 0x19d   : > { %361 = vperm.xlu0 %523, %v358_v28  }
 0x1a1   : > { %368 = vperm.xlu0 %523, %v365_v30  }
 0x218   : > { %v362_v31 = vpop.permute.xlu0 %361 }
 0x219   : > { %v364_v33 = vmul.f32 %v362_v31, %v357_v32 }
 0x21c   : > { %v369_v34 = vpop.permute.xlu0 %368 }
 0x21d   : > { %v371_v35 = vadd.f32 %v369_v34, %v364_v33 }
 0x21f   : > { %372 = vst [vmem:[#allocation7] sm:$0xff] %v371_v35 }
 0x220 PF: > { %p646_p8 = scmp.eq.s32.totalorder %s457_s18, 1  ;;  %s580_s30 = smov [#allocation7]  }
 0x221   : > { %s388_s5 = sshll.u32 %s580_s30, 4  ;;  %s389_s5 = int_to_ptr.vmem [resolvable:$true] %s388_s5 }
 0x222   : > { %s524_s6 = scalar_lea.vmem %s389_s5, 128  ;;  %s530_s7 = scalar_lea.vmem %s389_s5, 256 }
 0x223   : > { %p525_p9 = scmp.ne.s32.totalorder %s389_s5, %s524_s6  ;;  %p531_p12 = scmp.lt.s32.totalorder %s389_s5, %s389_s5 }
 0x224   : > { %p532_p13 = scmp.lt.s32.totalorder %s530_s7, %s524_s6 }
 0x225   : > { %p526_p10 = pnand %p525_p9, %p646_p8 }
 0x226   : > { %p533_p0 = por %p532_p13, %p531_p12 }
 0x227   : > { %p527_p11 = pneg %p526_p10 }
 0x229   : > { %p534_p1 = pnand %p533_p0, %p527_p11 }
 0x22b   : > { %537 = shalt.err (!%p534_p1)
}
 0x22c   : > { %482 = dma.vmem_to_hbm [thread:$0]  (%p646_p8), %s389_s5, 128, %s673_s4, [#allocation8]  }
 0x22d PF: > { %p490_p2 = scmp.ge.s32.totalorder %s574_s17, 2  ;;  %p491_p3 = scmp.eq.s32.totalorder %s458_s19, 1 }
 0x22f   : > { %p486_p4 = pnand %p491_p3, %p490_p2 }
 0x231   : > { %p487_p5 = pneg %p486_p4 }
 0x233   : > { %561 = dma.done.wait (%p487_p5), [#allocation8], 128  }
 0x234   : > { %563 = vsyncadd (%p487_p5), [#allocation8], 4294967168  ;;  %s17_s17 = sadd.s32 1, %s574_s17   ;;  %s675_s15 = smov %s570_s16 }
 0x235   : > { %p14_p6 = scmp.ge.s32.totalorder %s17_s17, 4   ;;  %s676_s16 = smov %s678_s20 }
 0x237   :  { %16 = sbr.rel (!%p14_p6) target bundleno = 3 (0x3), region = 89 }
 0x23c   :  { %406 = vsyncpa [#allocation8], 1 }
 0x23d   :  { %408 = vsyncpa [#allocation8 + $0x1], 1 }

</bundles_post_ra>
